<compile_context>
chip_gen: v6e
topology: v6e:2x2x1
jax: 0.10.0
libtpu: 0.0.40
codegen_flags: <defaults>
</compile_context>

<pallas_src>
import functools

import jax
import jax.numpy as jnp
from jax import lax
from jax.experimental import pallas as pl
from jax.experimental.pallas import tpu as pltpu


def _round_up(x, m):
    return -(-x // m) * m


def _largest_tile(dim_pad, target, unit=128):
    """Largest multiple of `unit` that divides dim_pad and is <= max(target, unit)."""
    t = min(max(target, unit), dim_pad)
    t = max((t // unit) * unit, unit)
    while dim_pad % t:
        t -= unit
    return t


def _vmem_capacity_bytes():
    try:
        info = pltpu.get_tpu_info()
        for name in ("vmem_capacity_bytes", "vmem_size_bytes", "vmem_bytes"):
            v = getattr(info, name, None)
            if v:
                return int(v)
    except Exception:
        pass
    return 64 << 20  # conservative fallback: v7x per-TensorCore physical VMEM


def _plan_tiles(M, K, N, x_isize, w_isize, o_isize, vmem_budget):
    K_pad = _round_up(K, 128)
    N_pad = _round_up(N, 128)
    sub = max(8, 32 // x_isize)  # sublane granularity for x/out rows

    if M <= 512:
        tm = _round_up(max(M, 1), sub)
        M_pad = tm
    else:
        tm = 512
        M_pad = _round_up(M, tm)

    tk = _largest_tile(K_pad, 2048)
    tn = _largest_tile(N_pad, 512)

    # Keep >= 2 parallel output blocks so both v7x TensorCores get work even
    # at decode-sized M (1 TC on v5e/v6e: harmless).
    if M_pad // tm == 1 and N_pad // tn == 1 and N_pad >= 256:
        tn = _largest_tile(N_pad, N_pad // 2)

    x_resident = True  # keep the (tm, K_pad) row-panel of x in VMEM across j & k

    def est(tm_, tk_, tn_, resident):
        x_cols = K_pad if resident else tk_
        return (2 * tm_ * x_cols * x_isize   # x blocks (double-buffered)
                + 2 * tk_ * tn_ * w_isize    # weight tiles
                + 2 * tm_ * tn_ * o_isize    # output tiles
                + tm_ * tn_ * 4              # f32 accumulator scratch
                + 2 * tn_ * 4)               # bias row

    for _ in range(32):
        if est(tm, tk, tn, x_resident) <= vmem_budget:
            break
        if x_resident and 2 * tm * K_pad * x_isize > vmem_budget // 2:
            x_resident = False
        elif tk > 512:
            tk = _largest_tile(K_pad, tk // 2)
        elif tn > 256:
            tn = _largest_tile(N_pad, tn // 2)
        elif tm > 256:
            tm = 256
            M_pad = _round_up(max(M, 1), tm)
        else:
            break

    return tm, tk, tn, M_pad, K_pad, N_pad, x_resident, est(tm, tk, tn, x_resident)


def _linear_kernel(x_ref, w_ref, b_ref, o_ref, acc_ref, *, tk, nk, x_resident,
                   compute_dtype):
    # x_ref:   (tm, K_pad) VMEM-resident row-panel of x  [or (tm, tk) streamed]
    # w_ref:   (tn, tk)    block of W in its native (N, K) layout
    # b_ref:   (1, tn)     f32 bias row block
    # o_ref:   (tm, tn)    output block (input dtype)
    # acc_ref: (tm, tn)    f32 accumulator scratch, resident across the k axis
    k = pl.program_id(2)

    if x_resident:
        start = pl.multiple_of(k * tk, tk)
        x_blk = x_ref[:, pl.ds(start, tk)]
    else:
        x_blk = x_ref[...]

    # x @ W.T on this tile; MXU contraction with f32 accumulation.
    p = lax.dot_general(
        x_blk.astype(compute_dtype),
        w_ref[...].astype(compute_dtype),
        dimension_numbers=(((1,), (1,)), ((), ())),
        preferred_element_type=jnp.float32,
    )

    if nk == 1:
        o_ref[...] = (p + b_ref[...]).astype(o_ref.dtype)
    else:
        @pl.when(k == 0)
        def _():
            acc_ref[...] = p

        @pl.when(jnp.logical_and(k > 0, k < nk - 1))
        def _():
            acc_ref[...] += p

        @pl.when(k == nk - 1)
        def _():
            # Fuse the final partial product + bias into the epilogue store:
            # saves one full (tm, tn) f32 accumulator store+load per tile.
            o_ref[...] = (acc_ref[...] + p + b_ref[...]).astype(o_ref.dtype)


def qkv_column_parallel_linear(x, weight, bias=None, *, compute_dtype=jnp.bfloat16):
    """Single-device forward of QKVColumnParallelLinear: y = x @ W.T + b.

    x:      (..., in_features)            any float dtype (tiles cast in-kernel).
    weight: (out_features, in_features)   native (N, K) layout; pre-cast to
                                          `compute_dtype` at init for minimum
                                          weight-stream HBM traffic.
    bias:   (out_features,) or None       added once, in f32, in the epilogue.
    """
    out_features, in_features = weight.shape
    assert out_features % 3 == 0, "The out_dim should be the combination of Q,K,V"
    assert x.shape[-1] == in_features

    out_dtype = x.dtype
    lead_shape = x.shape[:-1]
    M = 1
    for d in lead_shape:
        M *= d
    K, N = in_features, out_features

    x_isize = jnp.dtype(x.dtype).itemsize
    w_isize = jnp.dtype(weight.dtype).itemsize
    o_isize = jnp.dtype(out_dtype).itemsize

    phys_vmem = _vmem_capacity_bytes()
    vmem_budget = (phys_vmem * 3) // 4
    tm, tk, tn, M_pad, K_pad, N_pad, x_resident, _ = _plan_tiles(
        M, K, N, x_isize, w_isize, o_isize, vmem_budget)

    # --- operands (no transpose; pads are no-ops at production QKV shapes) ---
    x2d = x.reshape(M, K)
    if M_pad != M or K_pad != K:
        # Explicit zero-pad along K is required for a correct K-accumulation.
        x2d = jnp.pad(x2d, ((0, M_pad - M), (0, K_pad - K)))
    w2d = weight
    if N_pad != N or K_pad != K:
        w2d = jnp.pad(w2d, ((0, N_pad - N), (0, K_pad - K)))
    if bias is None:
        b2d = jnp.zeros((1, N_pad), jnp.float32)
    else:
        b2d = bias.astype(jnp.float32).reshape(1, N)
        if N_pad != N:
            b2d = jnp.pad(b2d, ((0, 0), (0, N_pad - N)))

    grid = (M_pad // tm, N_pad // tn, K_pad // tk)
    nk = grid[2]

    if x_resident:
        x_spec = pl.BlockSpec((tm, K_pad), lambda i, j, k: (i, 0))
    else:
        x_spec = pl.BlockSpec((tm, tk), lambda i, j, k: (i, k))

    # HBM traffic including re-streaming factors (advisory, for XLA scheduling).
    x_reads = 1 if x_resident else (N_pad // tn)
    w_reads = M_pad // tm
    cost = pl.CostEstimate(
        flops=2 * M_pad * K_pad * N_pad,
        transcendentals=0,
        bytes_accessed=int(
            x_reads * M_pad * K_pad * x_isize
            + w_reads * K_pad * N_pad * w_isize
            + w_reads * N_pad * 4
            + M_pad * N_pad * o_isize
        ),
    )

    kernel = functools.partial(
        _linear_kernel, tk=tk, nk=nk, x_resident=x_resident,
        compute_dtype=compute_dtype)

    out = pl.pallas_call(
        kernel,
        out_shape=jax.ShapeDtypeStruct((M_pad, N_pad), out_dtype),
        grid_spec=pltpu.PrefetchScalarGridSpec(
            num_scalar_prefetch=0,
            grid=grid,
            in_specs=[
                x_spec,
                pl.BlockSpec((tn, tk), lambda i, j, k: (j, k)),
                pl.BlockSpec((1, tn), lambda i, j, k: (0, j)),
            ],
            out_specs=pl.BlockSpec((tm, tn), lambda i, j, k: (i, j)),
            scratch_shapes=[pltpu.VMEM((tm, tn), jnp.float32)],
        ),
        compiler_params=pltpu.CompilerParams(
            dimension_semantics=("parallel", "parallel", "arbitrary"),
            vmem_limit_bytes=int(vmem_budget),
        ),
        cost_estimate=cost,
    )(x2d, w2d, b2d)

    if M_pad != M or N_pad != N:
        out = out[:M, :N]
    return out.reshape(*lead_shape, N)


if __name__ == "__main__":
    # Small shapes consistent with the module: batch=2, seq=8, in_features=32,
    # out_features=48 (divisible by 3 for Q, K, V).
    batch, seq = 2, 8
    in_features, out_features = 32, 48

    key = jax.random.PRNGKey(0)
    kx, kw = jax.random.split(key)

    x = jax.random.normal(kx, (batch, seq, in_features), dtype=jnp.float32)
    weight_f32 = (
        jax.random.normal(kw, (out_features, in_features), dtype=jnp.float32) * 0.02
    )
    # Pre-cast once at "parameter init" time (hoisted out of the per-call path).
    weight = weight_f32.astype(jnp.bfloat16)
    bias = jnp.zeros((out_features,), dtype=jnp.float32)

    y = qkv_column_parallel_linear(x, weight, bias)
    y = jax.block_until_ready(y)
    assert y.shape == (batch, seq, out_features)

    # Matched-precision reference (bf16 operands, f32 accumulate): tight tol.
    y_ref_bf16 = (
        jnp.dot(
            x.astype(jnp.bfloat16).reshape(-1, in_features),
            weight.T,
            preferred_element_type=jnp.float32,
        ).reshape(batch, seq, out_features)
        + bias
    )
    assert jnp.allclose(y, y_ref_bf16.astype(y.dtype), atol=1e-4, rtol=1e-4), (
        float(jnp.max(jnp.abs(y - y_ref_bf16)))
    )

    # Full-f32 F.linear reference: loose tol covers the bf16 casts.
    y_ref = x @ weight_f32.T + bias
    assert jnp.allclose(y, y_ref, atol=5e-3, rtol=5e-2), (
        float(jnp.max(jnp.abs(y - y_ref)))
    )

    print("KERNEL_OK")
</pallas_src>

<mosaic_0001>
module attributes {stable_mosaic.version = 11 : i64} {
  func.func @_linear_kernel(%arg0: i32, %arg1: i32, %arg2: i32, %arg3: memref<16x128xf32, #tpu.memory_space<vmem>>, %arg4: memref<128x128xbf16, #tpu.memory_space<vmem>>, %arg5: memref<1x128xf32, #tpu.memory_space<vmem>>, %arg6: memref<16x128xf32, #tpu.memory_space<vmem>>, %arg7: memref<16x128xf32, #tpu.memory_space<vmem>>) attributes {dimension_semantics = [#tpu.dimension_semantics<parallel>, #tpu.dimension_semantics<parallel>, #tpu.dimension_semantics<arbitrary>], iteration_bounds = array<i64: 1, 1, 1>, scalar_prefetch = 0 : i64, scratch_operands = 1 : i64, tpu.core_type = #tpu.core_type<tc>, window_params = [{transform_indices = @transform_0, window_bounds = array<i64: 16, 128>}, {transform_indices = @transform_1, window_bounds = array<i64: 128, 128>}, {transform_indices = @transform_2, window_bounds = array<i64: 1, 128>}, {transform_indices = @transform_3, window_bounds = array<i64: 16, 128>}]} {
    %c128_i32 = arith.constant 128 : i32
    %0 = arith.muli %arg2, %c128_i32 : i32
    %1 = tpu.assume_multiple %0, 128 : i32
    %c0 = arith.constant 0 : index
    %2 = arith.index_cast %1 : i32 to index
    %3 = vector.load %arg3[%c0, %2] : memref<16x128xf32, #tpu.memory_space<vmem>>, vector<16x128xf32>
    %4 = arith.truncf %3 : vector<16x128xf32> to vector<16x128xbf16>
    %c0_0 = arith.constant 0 : index
    %c0_1 = arith.constant 0 : index
    %5 = vector.load %arg4[%c0_0, %c0_1] : memref<128x128xbf16, #tpu.memory_space<vmem>>, vector<128x128xbf16>
    %cst = arith.constant dense<0.000000e+00> : vector<16x128xf32>
    %6 = tpu.matmul %4, %5, %cst {dimension_numbers = #tpu.dot_dimension_numbers<[1], [1], [0], [0], [0, 0, 1, 0], [], []>} : vector<16x128xbf16>, vector<128x128xbf16>, vector<16x128xf32> -> vector<16x128xf32>
    %c0_2 = arith.constant 0 : index
    %c0_3 = arith.constant 0 : index
    %7 = vector.load %arg5[%c0_2, %c0_3] : memref<1x128xf32, #tpu.memory_space<vmem>>, vector<1x128xf32>
    %8 = vector.broadcast %7 : vector<1x128xf32> to vector<16x128xf32>
    %9 = arith.addf %6, %8 : vector<16x128xf32>
    %c0_4 = arith.constant 0 : index
    %c0_5 = arith.constant 0 : index
    %10 = vector.load %arg6[%c0_4, %c0_5] : memref<16x128xf32, #tpu.memory_space<vmem>>, vector<16x128xf32>
    tpu.vector_store %arg6[%c0_4, %c0_5], %9 {strides = array<i32>} : memref<16x128xf32, #tpu.memory_space<vmem>>, vector<16x128xf32>,
    return
  }
  func.func @transform_0(%arg0: i32, %arg1: i32, %arg2: i32) -> (i32, i32) {
    %c0_i32 = arith.constant 0 : i32
    %c0_i32_0 = arith.constant 0 : i32
    return %arg0, %c0_i32 : i32, i32
  }
  func.func @transform_1(%arg0: i32, %arg1: i32, %arg2: i32) -> (i32, i32) {
    %c0_i32 = arith.constant 0 : i32
    return %arg1, %arg2 : i32, i32
  }
  func.func @transform_2(%arg0: i32, %arg1: i32, %arg2: i32) -> (i32, i32) {
    %c0_i32 = arith.constant 0 : i32
    %c0_i32_0 = arith.constant 0 : i32
    return %c0_i32, %arg1 : i32, i32
  }
  func.func @transform_3(%arg0: i32, %arg1: i32, %arg2: i32) -> (i32, i32) {
    %c0_i32 = arith.constant 0 : i32
    return %arg0, %arg1 : i32, i32
  }
}

</mosaic_0001>

<bundles_post_ra>
// kernel: tpu_custom_call.1
= control target key start
LH: loop header
LB: loop body
LE: loop exit
PB: predicated region body
PF: predicated region fallthrough
CT: control target
= control target key end

     0   :  { %8 = vsyncpa [#allocation4], 0  ;;  %s352_s0 = inlined_call_operand.hbm [shape: f32[16,128], index: 0, kind: input, shape index: {}]   ;;  %s353_s1 = inlined_call_operand.hbm [shape: bf16[128,128], index: 1, kind: input, shape index: {}]   ;;  %s354_s2 = inlined_call_operand.vmem [shape: f32[1,128], index: 2, kind: input, shape index: {}]   ;;  %s355_s3 = inlined_call_operand.hbm [shape: f32[16,128], index: 3, kind: output, shape index: {}]  }
   0x1   :  { %9 = vsyncpa [#allocation7], 0 }
   0x2   :  { %10 = vsyncpa [#allocation5], 0  ;;  %s305_s12 = smov [#allocation3]  }
   0x3   :  { %s16_s13 = sshll.u32 %s305_s12, 4  ;;  %s17_s13 = int_to_ptr.vmem [resolvable:$true] %s16_s13 }
   0x4   :  { %s247_s14 = scalar_lea.vmem %s17_s13, 256  ;;  %p252_p1 = scmp.lt.s32.totalorder %s17_s13, %s17_s13 }
   0x5   :  { %p248_p0 = scmp.ne.s32.totalorder %s17_s13, %s247_s14  ;;  %p253_p2 = scmp.lt.s32.totalorder %s247_s14, %s247_s14 }
   0x7   :  { %p254_p3 = por %p253_p2, %p252_p1 }
   0x9   :  { %p255_p4 = pnand %p254_p3, %p248_p0 }
   0xb   :  { %258 = shalt.err (!%p255_p4)
}
   0xc   :  { %s306_s15 = smov 128   ;;  %s307_s16 = smov 8  }
   0xd   :  { %22 = dma.hbm_to_vmem [thread:$0]  %s352_s0, 256, %s17_s13, [#allocation4], %s306_s15, %s306_s15, %s307_s16  }
   0xe   :  { %s308_s19 = smov [#allocation6]  }
   0xf   :  { %s28_s20 = sshll.u32 %s308_s19, 4  ;;  %s29_s20 = int_to_ptr.vmem [resolvable:$true] %s28_s20 }
  0x10   :  { %s267_s21 = scalar_lea.vmem %s29_s20, 1024  ;;  %p272_p6 = scmp.lt.s32.totalorder %s29_s20, %s29_s20 }
  0x11   :  { %p268_p5 = scmp.ne.s32.totalorder %s29_s20, %s267_s21  ;;  %p273_p7 = scmp.lt.s32.totalorder %s267_s21, %s267_s21 }
  0x13   :  { %p274_p8 = por %p273_p7, %p272_p6 }
  0x15   :  { %p275_p9 = pnand %p274_p8, %p268_p5 }
  0x17   :  { %278 = shalt.err (!%p275_p9)
}
  0x18   :  { %s309_s22 = smov 64   ;;  %s310_s23 = smov 4  }
  0x19   :  { %34 = dma.hbm_to_vmem [thread:$0]  %s353_s1, 1024, %s29_s20, [#allocation7], %s309_s22, %s309_s22, %s310_s23  }
  0x1a   :  { %299 = dma.done.wait [#allocation4], 256  }
  0x1b   :  { %300 = vsyncadd [#allocation4], 4294967040 }
  0x1c   :  { %301 = dma.done.wait [#allocation7], 1024  }
  0x1d   :  { %302 = vsyncadd [#allocation7], 4294966272  ;;  %v311_v0 = vmov 0.0   ;;  %vm312_vm0 = vmmov 0   ;;  %v231_v1 = vld [vmem:[#allocation6 + $0x38] sm:$0xff]   ;;  %v232_v2 = vld [vmem:[#allocation6 + $0x30] sm:$0xff]  }
  0x1e   :  { %202 = vmatprep.subr.bf16.mxu0 %v311_v0  ;;  %218 = vmatprep.mubr.msk.bf16.mxu0 %vm312_vm0, %v311_v0  ;;  %v233_v3 = vld [vmem:[#allocation6 + $0x28] sm:$0xff]   ;;  %v234_v4 = vld [vmem:[#allocation6 + $0x20] sm:$0xff]   ;;  %v235_v5 = vld [vmem:[#allocation6 + $0x18] sm:$0xff]   ;;  %s313_s26 = smov [#allocation8]  }
  0x1f   :  { %203 = vmatpush3.bf16.xpose.msra.mxu0 %v231_v1  ;;  %v236_v6 = vld [vmem:[#allocation6 + $0x10] sm:$0xff]   ;;  %v237_v7 = vld [vmem:[#allocation6 + $0x8] sm:$0xff]   ;;  %v238_v8 = vld [vmem:[#allocation6] sm:$0xff]   ;;  %s170_s27 = sshll.u32 %s313_s26, 4  ;;  %s171_s27 = int_to_ptr.vmem [resolvable:$true] %s170_s27 }
  0x20   :  { %204 = vmatprep.subr.bf16.mxu0 %v311_v0  ;;  %v48_v9 = vld [vmem:[#allocation3] sm:$0xff]  ;;  %v49_v10 = vld [vmem:[#allocation3 + $0x8] sm:$0xff]  ;;  %s279_s28 = scalar_lea.vmem %s171_s27, 256  ;;  %p284_p11 = scmp.lt.s32.totalorder %s171_s27, %s171_s27 }
  0x21   :  { %v50_v11 = vpack.c.bf16 %v49_v10, %v48_v9  ;;  %v184_v12 = vld [vmem:[%s354_s2] ss:$0 sm:$0xff]  ;;  %p280_p10 = scmp.ne.s32.totalorder %s171_s27, %s279_s28  ;;  %p285_p12 = scmp.lt.s32.totalorder %s279_s28, %s279_s28 }
  0x23   :  { %p286_p13 = por %p285_p12, %p284_p11 }
  0x25   :  { %p287_p0 = pnand %p286_p13, %p280_p10 }
  0x27   :  { %205 = vmatpush3.bf16.xpose.msra.mxu0 %v232_v2 }
  0x28   :  { %206 = vmatprep.subr.bf16.mxu0 %v311_v0 }
  0x2f   :  { %207 = vmatpush3.bf16.xpose.msra.mxu0 %v233_v3 }
  0x30   :  { %208 = vmatprep.subr.bf16.mxu0 %v311_v0 }
  0x37   :  { %209 = vmatpush3.bf16.xpose.msra.mxu0 %v234_v4 }
  0x38   :  { %210 = vmatprep.subr.bf16.mxu0 %v311_v0 }
  0x3f   :  { %211 = vmatpush3.bf16.xpose.msra.mxu0 %v235_v5 }
  0x40   :  { %212 = vmatprep.subr.bf16.mxu0 %v311_v0 }
  0x47   :  { %213 = vmatpush3.bf16.xpose.msra.mxu0 %v236_v6 }
  0x48   :  { %214 = vmatprep.subr.bf16.mxu0 %v311_v0 }
  0x4f   :  { %215 = vmatpush3.bf16.xpose.msra.mxu0 %v237_v7 }
  0x50   :  { %216 = vmatprep.subr.bf16.mxu0 %v311_v0 }
  0x57   :  { %217 = vmatpush3.bf16.xpose.msra.mxu0 %v238_v8 }
  0x5e   :  { %219 = vmatmul.mubr.bf16.vlgmr.msra.gmra.mxu0 %v50_v11 }
 0x11e   :  { %v156_v13 = vpop.f32.mrf.mxu0 }
 0x11f   :  { %v157_v14 = vadd.f32 %v184_v12, %v156_v13 }
 0x120   :  { %v220_v15 = vpop.f32.mrf.mxu0 }
 0x121   :  { %163 = vst [vmem:[#allocation8] sm:$0xff] %v157_v14 }
 0x122   :  { %v159_v16 = vpop.f32.mrf.mxu0 }
 0x123   :  { %v160_v17 = vadd.f32 %v184_v12, %v159_v16 }
 0x124   :  { %v221_v18 = vpop.f32.mrf.mxu0 }
 0x125   :  { %164 = vst [vmem:[#allocation8 + $0x8] sm:$0xff] %v160_v17 }
 0x126   :  { %290 = shalt.err (!%p287_p0)
}
 0x127   :  { %176 = dma.vmem_to_hbm [thread:$0]  %s171_s27, 256, %s355_s3, [#allocation5], %s306_s15, %s306_s15, %s307_s16  }
 0x128   :  { %303 = dma.done.wait [#allocation5], 256  }
 0x129   :  { %304 = vsyncadd [#allocation5], 4294967040 }
 0x12a   :  { %180 = vsyncpa [#allocation4], 1 }
 0x12b   :  { %181 = vsyncpa [#allocation7], 1 }
 0x12c   :  { %182 = vsyncpa [#allocation5], 1 }

</bundles_post_ra>
